<compile_context>
chip_gen: v6e
topology: v6e:2x2x1
jax: 0.10.0
libtpu: 0.0.40
codegen_flags: <defaults>
</compile_context>

<pallas_src>
import jax
import jax.numpy as jnp
from jax.experimental import pallas as pl
from jax.experimental.pallas import tpu as pltpu


def _leaky_relu(h, slope=0.2):
    # For 0 < slope < 1:  leaky_relu(h) == max(h, slope*h)
    return jnp.maximum(h, slope * h)


def _round_up(n, m):
    return ((n + m - 1) // m) * m


def coupling_kernel(xT_ref,
                    w0_ref, b0_ref, w1_ref, b1_ref,
                    w2_ref, b2_ref, w3_ref, b3_ref,
                    out_ref):
    """One batch tile in transposed layout: activations are (feature, B_tile).

    The coupling mask is already folded into w0 / w3 / b3, so the whole layer
    is just  out = x + MLP(x)  with bf16 matmuls and f32 accumulate/residual.
    """
    xT = xT_ref[...]                                                # (D, TB) f32
    x_bf = xT.astype(jnp.bfloat16)

    h = jnp.dot(w0_ref[...], x_bf,
                preferred_element_type=jnp.float32) + b0_ref[...]   # (H, TB)
    h = _leaky_relu(h)
    h = jnp.dot(w1_ref[...], h.astype(jnp.bfloat16),
                preferred_element_type=jnp.float32) + b1_ref[...]
    h = _leaky_relu(h)
    h = jnp.dot(w2_ref[...], h.astype(jnp.bfloat16),
                preferred_element_type=jnp.float32) + b2_ref[...]
    h = _leaky_relu(h)
    m = jnp.dot(w3_ref[...], h.astype(jnp.bfloat16),
                preferred_element_type=jnp.float32) + b3_ref[...]   # (D, TB)

    out_ref[...] = xT + m                       # f32 residual, lane-dense store


def coupling_layer_forward(x, mask, params, *, block_b=2048):
    """x: (B, D) f32, mask: (1, D) binary, params: 4 x (W [in,out], b [1,out])."""
    B, D = x.shape
    (w0, b0), (w1, b1), (w2, b2), (w3, b3) = params
    H = w0.shape[1]
    mask = mask.reshape(1, D).astype(jnp.float32)

    # --- constant-fold the binary coupling mask into the first / last layer ---
    w0f = w0 * mask.reshape(D, 1)          # == diag(mask) @ W0   (mask the input)
    w3f = w3 * (1.0 - mask)                # == W3 @ diag(1-mask) (mask the output)
    b3f = b3 * (1.0 - mask)

    # Transposed (out, in) bf16 weights: the kernel computes W^T @ x^T so the
    # batch dimension sits on lanes. Biases kept f32, shaped (out, 1).
    w0t = w0f.T.astype(jnp.bfloat16)       # (H, D)
    w1t = w1.T.astype(jnp.bfloat16)        # (H, H)
    w2t = w2.T.astype(jnp.bfloat16)        # (H, H)
    w3t = w3f.T.astype(jnp.bfloat16)       # (D, H)
    b0t = b0.reshape(H, 1).astype(jnp.float32)
    b1t = b1.reshape(H, 1).astype(jnp.float32)
    b2t = b2.reshape(H, 1).astype(jnp.float32)
    b3t = b3f.reshape(D, 1).astype(jnp.float32)

    # --- batch-on-lanes layout: pad batch to a lane-aligned tile, transpose ---
    tb = _round_up(min(block_b, _round_up(B, 128)), 128)
    Bp = _round_up(B, tb)
    xT = jnp.pad(x.astype(jnp.float32).T, ((0, 0), (0, Bp - B)))

    grid = (Bp // tb,)

    def tile_map(i):          # x / out tiles stream along the batch axis
        return (0, i)

    def resident_map(i):      # weights & biases stay VMEM-resident across steps
        return (0, 0)

    def resident(shape):
        return pl.BlockSpec(shape, resident_map)

    # Explicit VMEM budget: resident weights/biases + double-buffered x/out tiles.
    vmem_bytes = int(
        2 * (w0t.size + w1t.size + w2t.size + w3t.size)      # bf16 weights
        + 4 * (b0t.size + b1t.size + b2t.size + b3t.size)    # f32 biases
        + 2 * 2 * 4 * D * tb                                  # 2x dbl-buffered f32 tiles
        + 4 * 4 * H * tb)                                     # live f32 intermediates
    vmem_limit = int(min(max(8 * vmem_bytes, 8 << 20), 64 << 20))

    yT = pl.pallas_call(
        coupling_kernel,
        out_shape=jax.ShapeDtypeStruct((D, Bp), jnp.float32),
        grid_spec=pltpu.PrefetchScalarGridSpec(
            num_scalar_prefetch=0,
            grid=grid,
            in_specs=[
                pl.BlockSpec((D, tb), tile_map),              # x^T (streams)
                resident((H, D)), resident((H, 1)),           # W0', b0
                resident((H, H)), resident((H, 1)),           # W1,  b1
                resident((H, H)), resident((H, 1)),           # W2,  b2
                resident((D, H)), resident((D, 1)),           # W3', b3'
            ],
            out_specs=pl.BlockSpec((D, tb), tile_map),
        ),
        compiler_params=pltpu.CompilerParams(
            dimension_semantics=("parallel",),                # v7x: shard across TCs
            vmem_limit_bytes=vmem_limit),
    )(xT, w0t, b0t, w1t, b1t, w2t, b2t, w3t, b3t)

    return yT[:, :B].T.astype(x.dtype)


def init_params(key, input_dim, hidden_dim, num_layers=4):
    """Deterministic init, PyTorch-Linear-style uniform(-1/sqrt(fan_in), +)."""
    dims = [input_dim] + [hidden_dim] * (num_layers - 1) + [input_dim]
    params = []
    for i in range(num_layers):
        fan_in, fan_out = dims[i], dims[i + 1]
        key, kw, kb = jax.random.split(key, 3)
        bound = 1.0 / jnp.sqrt(fan_in)
        W = jax.random.uniform(kw, (fan_in, fan_out), jnp.float32, -bound, bound)
        b = jax.random.uniform(kb, (1, fan_out), jnp.float32, -bound, bound)
        params.append((W, b))
    return params


def coupling_layer_ref(x, mask, params):
    """Plain-JAX f32 reference mirroring the PyTorch forward exactly."""
    x1 = mask * x
    x2 = (1.0 - mask) * x
    h = x1
    n = len(params)
    for i, (W, b) in enumerate(params):
        h = h @ W + b
        if i < n - 1:
            h = jnp.where(h > 0, h, 0.2 * h)
    return x1 + x2 + h * (1.0 - mask)


def coupling_layer_ref_bf16(x, mask, params):
    """Reference with the kernel's dtype policy (bf16 matmul, f32 accumulate)."""
    x1 = mask * x
    x2 = (1.0 - mask) * x
    h = x1
    n = len(params)
    for i, (W, b) in enumerate(params):
        h = jnp.dot(h.astype(jnp.bfloat16), W.astype(jnp.bfloat16),
                    preferred_element_type=jnp.float32) + b
        if i < n - 1:
            h = jnp.where(h > 0, h, 0.2 * h)
    return x1 + x2 + h * (1.0 - mask)


if __name__ == "__main__":
    B, D, H = 256, 4, 32          # batch, input_dim, hidden_dim (num_layers=4)

    key = jax.random.PRNGKey(0)
    key, kx = jax.random.split(key)
    x = jax.random.normal(kx, (B, D), jnp.float32)

    # alternating binary mask over the feature dim (typical coupling mask)
    mask = (jnp.arange(D) % 2).astype(jnp.float32).reshape(1, D)
    params = init_params(key, D, H, num_layers=4)

    # block_b=128 -> 2 grid steps at B=256 (exercises streaming + resident weights)
    y = coupling_layer_forward(x, mask, params, block_b=128)
    y = jax.block_until_ready(y)
    assert y.shape == (B, D)

    # tight check vs. a reference using the same bf16-matmul/f32-accumulate policy
    y_bf = coupling_layer_ref_bf16(x, mask, params)
    assert jnp.allclose(y, y_bf, atol=2e-3, rtol=2e-3), "mismatch vs bf16 reference"

    # sanity check vs. the pure-f32 PyTorch-equivalent reference
    y_f32 = coupling_layer_ref(x, mask, params)
    assert jnp.allclose(y, y_f32, atol=5e-2, rtol=5e-2), "mismatch vs f32 reference"

    # a batch that is not a multiple of 128 (exercises lane padding + slicing)
    x_odd = jax.random.normal(jax.random.PRNGKey(1), (37, D), jnp.float32)
    y_odd = jax.block_until_ready(coupling_layer_forward(x_odd, mask, params))
    assert y_odd.shape == (37, D)
    assert jnp.allclose(y_odd, coupling_layer_ref_bf16(x_odd, mask, params),
                        atol=2e-3, rtol=2e-3), "mismatch on padded batch"

    # single-tile large-block path (default block_b) on the same data
    y_big = jax.block_until_ready(coupling_layer_forward(x, mask, params))
    assert jnp.allclose(y_big, y_bf, atol=2e-3, rtol=2e-3), "mismatch at default tile"

    print("KERNEL_OK")
</pallas_src>

<mosaic_0001>
module attributes {stable_mosaic.version = 11 : i64} {
  func.func @coupling_kernel(%arg0: i32, %arg1: memref<4x128xf32, #tpu.memory_space<vmem>>, %arg2: memref<32x4xbf16, #tpu.memory_space<vmem>>, %arg3: memref<32x1xf32, #tpu.memory_space<vmem>>, %arg4: memref<32x32xbf16, #tpu.memory_space<vmem>>, %arg5: memref<32x1xf32, #tpu.memory_space<vmem>>, %arg6: memref<32x32xbf16, #tpu.memory_space<vmem>>, %arg7: memref<32x1xf32, #tpu.memory_space<vmem>>, %arg8: memref<4x32xbf16, #tpu.memory_space<vmem>>, %arg9: memref<4x1xf32, #tpu.memory_space<vmem>>, %arg10: memref<4x128xf32, #tpu.memory_space<vmem>>) attributes {dimension_semantics = [#tpu.dimension_semantics<parallel>], iteration_bounds = array<i64: 2>, scalar_prefetch = 0 : i64, scratch_operands = 0 : i64, tpu.core_type = #tpu.core_type<tc>, window_params = [{transform_indices = @transform_0, window_bounds = array<i64: 4, 128>}, {pipeline_mode = #tpu.pipeline_mode<synchronous>, transform_indices = @transform_1, window_bounds = array<i64: 32, 4>}, {pipeline_mode = #tpu.pipeline_mode<synchronous>, transform_indices = @transform_2, window_bounds = array<i64: 32, 1>}, {pipeline_mode = #tpu.pipeline_mode<synchronous>, transform_indices = @transform_3, window_bounds = array<i64: 32, 32>}, {pipeline_mode = #tpu.pipeline_mode<synchronous>, transform_indices = @transform_4, window_bounds = array<i64: 32, 1>}, {pipeline_mode = #tpu.pipeline_mode<synchronous>, transform_indices = @transform_5, window_bounds = array<i64: 32, 32>}, {pipeline_mode = #tpu.pipeline_mode<synchronous>, transform_indices = @transform_6, window_bounds = array<i64: 32, 1>}, {pipeline_mode = #tpu.pipeline_mode<synchronous>, transform_indices = @transform_7, window_bounds = array<i64: 4, 32>}, {pipeline_mode = #tpu.pipeline_mode<synchronous>, transform_indices = @transform_8, window_bounds = array<i64: 4, 1>}, {transform_indices = @transform_9, window_bounds = array<i64: 4, 128>}]} {
    %c0 = arith.constant 0 : index
    %c0_0 = arith.constant 0 : index
    %0 = vector.load %arg1[%c0, %c0_0] : memref<4x128xf32, #tpu.memory_space<vmem>>, vector<4x128xf32>
    %1 = arith.truncf %0 : vector<4x128xf32> to vector<4x128xbf16>
    %c0_1 = arith.constant 0 : index
    %c0_2 = arith.constant 0 : index
    %2 = vector.load %arg2[%c0_1, %c0_2] : memref<32x4xbf16, #tpu.memory_space<vmem>>, vector<32x4xbf16>
    %cst = arith.constant dense<0.000000e+00> : vector<32x128xf32>
    %3 = tpu.matmul %2, %1, %cst {dimension_numbers = #tpu.dot_dimension_numbers<[1], [0], [0], [1], [0, 0, 1, 1], [], []>} : vector<32x4xbf16>, vector<4x128xbf16>, vector<32x128xf32> -> vector<32x128xf32>
    %c0_3 = arith.constant 0 : index
    %c0_4 = arith.constant 0 : index
    %4 = vector.load %arg3[%c0_3, %c0_4] : memref<32x1xf32, #tpu.memory_space<vmem>>, vector<32x1xf32>
    %5 = vector.broadcast %4 : vector<32x1xf32> to vector<32x128xf32>
    %6 = arith.addf %3, %5 : vector<32x128xf32>
    %cst_5 = arith.constant 2.000000e-01 : f32
    %7 = vector.broadcast %cst_5 : f32 to vector<32x128xf32>
    %8 = arith.mulf %7, %6 : vector<32x128xf32>
    %9 = arith.maximumf %6, %8 : vector<32x128xf32>
    %c0_6 = arith.constant 0 : index
    %c0_7 = arith.constant 0 : index
    %10 = vector.load %arg4[%c0_6, %c0_7] : memref<32x32xbf16, #tpu.memory_space<vmem>>, vector<32x32xbf16>
    %11 = arith.truncf %9 : vector<32x128xf32> to vector<32x128xbf16>
    %cst_8 = arith.constant dense<0.000000e+00> : vector<32x128xf32>
    %12 = tpu.matmul %10, %11, %cst_8 {dimension_numbers = #tpu.dot_dimension_numbers<[1], [0], [0], [1], [0, 0, 1, 1], [], []>} : vector<32x32xbf16>, vector<32x128xbf16>, vector<32x128xf32> -> vector<32x128xf32>
    %c0_9 = arith.constant 0 : index
    %c0_10 = arith.constant 0 : index
    %13 = vector.load %arg5[%c0_9, %c0_10] : memref<32x1xf32, #tpu.memory_space<vmem>>, vector<32x1xf32>
    %14 = vector.broadcast %13 : vector<32x1xf32> to vector<32x128xf32>
    %15 = arith.addf %12, %14 : vector<32x128xf32>
    %cst_11 = arith.constant 2.000000e-01 : f32
    %16 = vector.broadcast %cst_11 : f32 to vector<32x128xf32>
    %17 = arith.mulf %16, %15 : vector<32x128xf32>
    %18 = arith.maximumf %15, %17 : vector<32x128xf32>
    %c0_12 = arith.constant 0 : index
    %c0_13 = arith.constant 0 : index
    %19 = vector.load %arg6[%c0_12, %c0_13] : memref<32x32xbf16, #tpu.memory_space<vmem>>, vector<32x32xbf16>
    %20 = arith.truncf %18 : vector<32x128xf32> to vector<32x128xbf16>
    %cst_14 = arith.constant dense<0.000000e+00> : vector<32x128xf32>
    %21 = tpu.matmul %19, %20, %cst_14 {dimension_numbers = #tpu.dot_dimension_numbers<[1], [0], [0], [1], [0, 0, 1, 1], [], []>} : vector<32x32xbf16>, vector<32x128xbf16>, vector<32x128xf32> -> vector<32x128xf32>
    %c0_15 = arith.constant 0 : index
    %c0_16 = arith.constant 0 : index
    %22 = vector.load %arg7[%c0_15, %c0_16] : memref<32x1xf32, #tpu.memory_space<vmem>>, vector<32x1xf32>
    %23 = vector.broadcast %22 : vector<32x1xf32> to vector<32x128xf32>
    %24 = arith.addf %21, %23 : vector<32x128xf32>
    %cst_17 = arith.constant 2.000000e-01 : f32
    %25 = vector.broadcast %cst_17 : f32 to vector<32x128xf32>
    %26 = arith.mulf %25, %24 : vector<32x128xf32>
    %27 = arith.maximumf %24, %26 : vector<32x128xf32>
    %c0_18 = arith.constant 0 : index
    %c0_19 = arith.constant 0 : index
    %28 = vector.load %arg8[%c0_18, %c0_19] : memref<4x32xbf16, #tpu.memory_space<vmem>>, vector<4x32xbf16>
    %29 = arith.truncf %27 : vector<32x128xf32> to vector<32x128xbf16>
    %cst_20 = arith.constant dense<0.000000e+00> : vector<4x128xf32>
    %30 = tpu.matmul %28, %29, %cst_20 {dimension_numbers = #tpu.dot_dimension_numbers<[1], [0], [0], [1], [0, 0, 1, 1], [], []>} : vector<4x32xbf16>, vector<32x128xbf16>, vector<4x128xf32> -> vector<4x128xf32>
    %c0_21 = arith.constant 0 : index
    %c0_22 = arith.constant 0 : index
    %31 = vector.load %arg9[%c0_21, %c0_22] : memref<4x1xf32, #tpu.memory_space<vmem>>, vector<4x1xf32>
    %32 = vector.broadcast %31 : vector<4x1xf32> to vector<4x128xf32>
    %33 = arith.addf %30, %32 : vector<4x128xf32>
    %34 = arith.addf %0, %33 : vector<4x128xf32>
    %c0_23 = arith.constant 0 : index
    %c0_24 = arith.constant 0 : index
    %35 = vector.load %arg10[%c0_23, %c0_24] : memref<4x128xf32, #tpu.memory_space<vmem>>, vector<4x128xf32>
    tpu.vector_store %arg10[%c0_23, %c0_24], %34 {strides = array<i32>} : memref<4x128xf32, #tpu.memory_space<vmem>>, vector<4x128xf32>,
    return
  }
  func.func @transform_0(%arg0: i32) -> (i32, i32) {
    %c0_i32 = arith.constant 0 : i32
    %c0_i32_0 = arith.constant 0 : i32
    return %c0_i32, %arg0 : i32, i32
  }
  func.func @transform_1(%arg0: i32) -> (i32, i32) {
    %c0_i32 = arith.constant 0 : i32
    %c0_i32_0 = arith.constant 0 : i32
    %c0_i32_1 = arith.constant 0 : i32
    return %c0_i32, %c0_i32_0 : i32, i32
  }
  func.func @transform_2(%arg0: i32) -> (i32, i32) {
    %c0_i32 = arith.constant 0 : i32
    %c0_i32_0 = arith.constant 0 : i32
    %c0_i32_1 = arith.constant 0 : i32
    return %c0_i32, %c0_i32_0 : i32, i32
  }
  func.func @transform_3(%arg0: i32) -> (i32, i32) {
    %c0_i32 = arith.constant 0 : i32
    %c0_i32_0 = arith.constant 0 : i32
    %c0_i32_1 = arith.constant 0 : i32
    return %c0_i32, %c0_i32_0 : i32, i32
  }
  func.func @transform_4(%arg0: i32) -> (i32, i32) {
    %c0_i32 = arith.constant 0 : i32
    %c0_i32_0 = arith.constant 0 : i32
    %c0_i32_1 = arith.constant 0 : i32
    return %c0_i32, %c0_i32_0 : i32, i32
  }
  func.func @transform_5(%arg0: i32) -> (i32, i32) {
    %c0_i32 = arith.constant 0 : i32
    %c0_i32_0 = arith.constant 0 : i32
    %c0_i32_1 = arith.constant 0 : i32
    return %c0_i32, %c0_i32_0 : i32, i32
  }
  func.func @transform_6(%arg0: i32) -> (i32, i32) {
    %c0_i32 = arith.constant 0 : i32
    %c0_i32_0 = arith.constant 0 : i32
    %c0_i32_1 = arith.constant 0 : i32
    return %c0_i32, %c0_i32_0 : i32, i32
  }
  func.func @transform_7(%arg0: i32) -> (i32, i32) {
    %c0_i32 = arith.constant 0 : i32
    %c0_i32_0 = arith.constant 0 : i32
    %c0_i32_1 = arith.constant 0 : i32
    return %c0_i32, %c0_i32_0 : i32, i32
  }
  func.func @transform_8(%arg0: i32) -> (i32, i32) {
    %c0_i32 = arith.constant 0 : i32
    %c0_i32_0 = arith.constant 0 : i32
    %c0_i32_1 = arith.constant 0 : i32
    return %c0_i32, %c0_i32_0 : i32, i32
  }
  func.func @transform_9(%arg0: i32) -> (i32, i32) {
    %c0_i32 = arith.constant 0 : i32
    %c0_i32_0 = arith.constant 0 : i32
    return %c0_i32, %arg0 : i32, i32
  }
}

</mosaic_0001>

<bundles_post_ra>
// kernel: tpu_custom_call.1
= control target key start
LH: loop header
LB: loop body
LE: loop exit
PB: predicated region body
PF: predicated region fallthrough
CT: control target
= control target key end

     0   :  { %14 = vsyncpa [#allocation3], 0  ;;  %s1176_s0 = inlined_call_operand.vmem [shape: f32[4,256], index: 0, kind: input, shape index: {}]   ;;  %s1177_s1 = inlined_call_operand.vmem [shape: bf16[32,4], index: 1, kind: input, shape index: {}]   ;;  %s1178_s2 = inlined_call_operand.vmem [shape: f32[32,1], index: 2, kind: input, shape index: {}]   ;;  %s1179_s3 = inlined_call_operand.vmem [shape: bf16[32,32], index: 3, kind: input, shape index: {}]   ;;  %s1180_s4 = inlined_call_operand.vmem [shape: f32[32,1], index: 4, kind: input, shape index: {}]   ;;  %s1181_s5 = inlined_call_operand.vmem [shape: bf16[32,32], index: 5, kind: input, shape index: {}]   ;;  %s1182_s6 = inlined_call_operand.vmem [shape: f32[32,1], index: 6, kind: input, shape index: {}]   ;;  %s1183_s7 = inlined_call_operand.vmem [shape: bf16[4,32], index: 7, kind: input, shape index: {}]   ;;  %s1184_s8 = inlined_call_operand.vmem [shape: f32[4,1], index: 8, kind: input, shape index: {}]   ;;  %s1185_s9 = inlined_call_operand.hbm [shape: f32[4,256], index: 9, kind: output, shape index: {}]  }
   0x1   :  { %16 = vsyncpa [#allocation3 + $0x1], 0  ;;  %s1005_s30 = smov 0   ;;  %s1007_s10 = smov 0  }
   0x2   :  { %s1009_s11 = smov 0   ;;  %s1011_s12 = smov 0  }
   0x3 LB: > { %s1026_s13 = sadd.s32 4294967295, %s949_s12   ;;  %s771_s14 = sadd.s32 4294967294, %s949_s12   ;;  %s949_s12 = sphi %s1011_s12, %s1191_s12   ;;  %s945_s11 = sphi %s1009_s11, %s1190_s11   ;;  %s941_s10 = sphi %s1007_s10, %s1189_s10   ;;  %s937_s30 = sphi %s1005_s30, %s1188_s30  }
   0x4   : > { %s1030_s15 = sadd.s32 1, %s949_s12   ;;  %s223_s16 = sadd.s32 1, %s945_s11 }
   0x5   : > { %s220_s17 = ssub.s32 %s949_s12, %s1030_s15  ;;  %p233_p0 = scmp.ne.s32.totalorder %s945_s11, %s941_s10 }
   0x6   : > { %p221_p1 = scmp.eq.s32.totalorder %s220_s17, 0  ;;  %p234_p2 = scmp.eq.s32.totalorder %s1026_s13, 1 }
   0x7   : > { %p239_p3 = scmp.ne.s32.totalorder %s941_s10, %s937_s30  ;;  %p240_p4 = scmp.eq.s32.totalorder %s771_s14, 1 }
   0x8   : > { %s1041_s18 = scalar_select %p221_p1, %s945_s11, %s223_s16  }
   0x9   : > { %p1043_p5 = por %p234_p2, %p233_p0  ;;  %p1047_p6 = por %p240_p4, %p239_p3 }
   0xa   : > { %p774_p7 = scmp.ge.s32.totalorder %s949_s12, 1  ;;  %p289_p8 = scmp.lt.s32.totalorder %s949_s12, 3 }
   0xc   : > { %p290_p9 = pnand %p774_p7, %p289_p8 }
   0xd   : > { %p324_p10 = scmp.lt.s32.totalorder (!%p290_p9), %s1026_s13, 1  ;;  %s321_s14 = sand.u32 (!%p290_p9), 1, %s941_s10  }
   0xe   : > { %293 = sbr.rel (%p290_p9) target bundleno = 879 (0x36f), region = 56  ;;  %s791_s17 = sshll.u32 (!%p290_p9), %s1026_s13, 6 }
   0xf   : > { %s1135_s25 = scalar_lea.hbm (!%p290_p9), %s1185_s9, %s791_s17  ;;  %s954_s27 = smov (!%p290_p9), [#allocation2]  }
  0x13   : > { %v883_v0 = vld [vmem:[%s1177_s1] sm:$0xff]   ;;  %vm369_vm0 = vcmask 31744   ;;  %s325_s23 = scalar_select %p324_p10, %s1026_s13, 1  ;;  %v337_v1 = vld [vmem:[%s1178_s2 + $0x10] sm:$0xff]  ;;  %v951_v2 = vmov 0   ;;  %v338_v4 = vld [vmem:[%s1178_s2 + $0x18] sm:$0xff] }
  0x14   : > { %810 = vmatprep.mubr.msk.bf16.mxu0 %vm369_vm0, %v883_v0  ;;  %881 = vset.pattern.permute.xlu0 %v951_v2  ;;  %v335_v3 = vld [vmem:[%s1178_s2] sm:$0xff]  ;;  %vm376_vm1 = vcmask 1041408   ;;  %v336_v6 = vld [vmem:[%s1178_s2 + $0x8] sm:$0xff]  ;;  %v445_v10 = vld [vmem:[%s1180_s4 + $0x10] sm:$0xff]  ;;  %vm477_vm2 = vcmask 261120   ;;  %vm953_vm3 = vmmov 0  }
  0x15   : > { %s776_s28 = sshll.u32 %s325_s23, 2  ;;  %351 = vperm.xlu0 %881, %v337_v1   ;;  %882 = vset.pattern.permute.xlu1 %v951_v2  ;;  %v884_v8 = vld [vmem:[%s1177_s1 + $0x8] sm:$0xff]   ;;  %v446_v11 = vld [vmem:[%s1180_s4 + $0x18] sm:$0xff]  ;;  %v443_v12 = vld [vmem:[%s1180_s4] sm:$0xff]  ;;  %s699_s13 = scalar_lea.sflag [#allocation3], %s321_s14 }
  0x16   : > { %s327_s16 = scalar_lea.vmem %s1176_s0, %s776_s28  ;;  %341 = vperm.xlu1 %882, %v335_v3   ;;  %v444_v13 = vld [vmem:[%s1180_s4 + $0x8] sm:$0xff]  ;;  %v549_v14 = vld [vmem:[%s1182_s6 + $0x10] sm:$0xff]  ;;  %v550_v15 = vld [vmem:[%s1182_s6 + $0x18] sm:$0xff]  ;;  %v952_v3 = vmov 0.0   ;;  %s893_s28 = sshll.u32 %s954_s27, 4  ;;  %s894_s28 = int_to_ptr.vmem [resolvable:$false] %s893_s28 }
  0x17   : > { %v1071_v5 = vld [vmem:[%s327_s16] sm:$0xf]  ;;  %v548_v17 = vld [vmem:[%s1182_s6 + $0x8] sm:$0xff]  ;;  %s775_s16 = sshll.u32 %s321_s14, 2  ;;  %s895_s29 = scalar_lea.vmem %s894_s28, 128 }
  0x18   : > { %v330_v7 = vpack.c.bf16 %v1071_v5, %v1071_v5  ;;  %v547_v16 = vld [vmem:[%s1182_s6] sm:$0xff]  ;;  %v886_v42 = vld [vmem:[%s1179_s3 + $0x8] sm:$0xff]   ;;  %s323_s21 = scalar_lea.vmem [#allocation2], %s775_s16 }
  0x19   : > { %356 = vperm.xlu0 %881, %v338_v4   ;;  %v647_v18 = vld [vmem:[%s1184_s8] sm:$0xf]  ;;  %v888_v2 = vld [vmem:[%s1181_s5 + $0x8] sm:$0xff]   ;;  %s712_s22 = sshll.u32 %s323_s21, 4  ;;  %s1137_s22 = int_to_ptr.vmem [resolvable:$true] %s712_s22 }
  0x1a   : > { %838 = vmatprep.subr.msk.bf16.mxu0 %vm376_vm1, %v330_v7  ;;  %v378_v9 = vsel %vm376_vm1, %v330_v7, 0  ;;  %346 = vperm.xlu1 %882, %v336_v6   ;;  %v885_v19 = vld [vmem:[%s1179_s3] sm:$0xff]   ;;  %s889_s26 = scalar_lea.vmem %s1137_s22, 64  ;;  %p896_p0 = scmp.lt.s32.totalorder %s1137_s22, %s894_s28 }
  0x1b   : > { %809 = vmatpush3.bf16.msra.mxu0 %v378_v9  ;;  %818 = vmatprep.mubr.msk.bf16.mxu1 %vm477_vm2, %v885_v19  ;;  %v887_v43 = vld [vmem:[%s1181_s5] sm:$0xff]   ;;  %p890_p11 = scmp.ne.s32.totalorder %s1137_s22, %s889_s26  ;;  %p897_p1 = scmp.lt.s32.totalorder %s895_s29, %s889_s26 }
  0x1d   : > { %459 = vperm.xlu0 %881, %v445_v10   ;;  %p891_p12 = pnand %p890_p11, %p1043_p5  ;;  %p898_p2 = por %p897_p1, %p896_p0 }
  0x1e   : > { %811 = vmatmul.mubr.msk.bf16.vlgmr.msra.gmra.mxu0 %vm369_vm0, %v884_v8  ;;  %464 = vperm.xlu1 %882, %v446_v11  }
  0x1f   : > { %826 = vmatprep.mubr.msk.bf16.mxu0 %vm477_vm2, %v887_v43  ;;  %p892_p13 = pneg %p891_p12 }
  0x21   : > { %449 = vperm.xlu0 %881, %v443_v12   ;;  %p899_p3 = pnand %p898_p2, %p892_p13 }
  0x22   : > { %454 = vperm.xlu1 %882, %v444_v13  }
  0x25   : > { %563 = vperm.xlu0 %881, %v549_v14  }
  0x26   : > { %568 = vperm.xlu1 %882, %v550_v15  }
  0x29   : > { %553 = vperm.xlu0 %881, %v547_v16  }
  0x2a   : > { %558 = vperm.xlu1 %882, %v548_v17  }
  0x2d   : > { %650 = vperm.xlu0 %881, %v647_v18  }
  0x90   : > { %v352_v20 = vpop.permute.xlu0 %351 }
  0x91   : > { %v342_v21 = vpop.permute.xlu1 %341 }
  0x94   : > { %v357_v26 = vpop.permute.xlu0 %356 }
  0x95   : > { %v347_v30 = vpop.permute.xlu1 %346 }
  0x98   : > { %v460_v44 = vpop.permute.xlu0 %459 }
  0x99   : > { %v465_v45 = vpop.permute.xlu1 %464 }
  0x9c   : > { %v450_v48 = vpop.permute.xlu0 %449 }
  0x9d   : > { %v455_v54 = vpop.permute.xlu1 %454 }
  0xa0   : > { %v564_v4 = vpop.permute.xlu0 %563 }
  0xa1   : > { %v569_v6 = vpop.permute.xlu1 %568 }
  0xa4   : > { %v554_v10 = vpop.permute.xlu0 %553 }
  0xa5   : > { %v559_v15 = vpop.permute.xlu1 %558 }
  0xde   : > { %v812_v22 = vpop.f32.mrf.mxu0 }
  0xdf   : > { %v423_v23 = vadd.f32 %v812_v22, %v352_v20 }
  0xe0   : > { %v414_v24 = vpop.f32.mrf.mxu0 }
  0xe1   : > { %v415_v25 = vadd.f32 %v414_v24, %v342_v21  ;;  %v431_v28 = vmul.f32 0.2, %v423_v23 }
  0xe2   : > { %v813_v27 = vpop.f32.mrf.mxu0 }
  0xe3   : > { %v426_v29 = vadd.f32 %v813_v27, %v357_v26  ;;  %v429_v32 = vmul.f32 0.2, %v415_v25  ;;  %v435_v35 = vmax.f32 %v423_v23, %v431_v28  ;;  %v644_v27 = vld [vmem:[%s1183_s7] sm:$0x3]  ;;  %v651_v28 = vpop.permute.xlu0 %650 }
  0xe4   : > { %v417_v31 = vpop.f32.mrf.mxu0 }
  0xe5   : > { %v432_v33 = vmul.f32 0.2, %v426_v29  ;;  %v418_v34 = vadd.f32 %v417_v31, %v347_v30  ;;  %v433_v38 = vmax.f32 %v415_v25, %v429_v32 }
  0xe7   : > { %v436_v36 = vmax.f32 %v426_v29, %v432_v33  ;;  %v430_v37 = vmul.f32 0.2, %v418_v34 }
  0xe9   : > { %v434_v39 = vmax.f32 %v418_v34, %v430_v37  ;;  %v442_v40 = vpack.c.bf16 %v436_v36, %v435_v35 }
  0xeb   : > { %814 = vmatprep.subr.bf16.mxu1 %v442_v40  ;;  %v441_v41 = vpack.c.bf16 %v434_v39, %v433_v38 }
  0xec   : > { %815 = vmatpush3.bf16.msra.mxu1 %v442_v40 }
  0xed   : > { %816 = vmatprep.subr.bf16.mxu1 %v441_v41 }
  0xf0   : > { %817 = vmatpush3.bf16.msra.mxu1 %v441_v41 }
  0xf1   : > { %830 = vmatprep.subr.bf16.mxu1 %v952_v3 }
  0xf3   : > { %819 = vmatmul.mubr.msk.bf16.vlgmr.msra.gmra.mxu1 %vm477_vm2, %v886_v42 }
  0xf4   : > { %834 = vmatprep.mubr.msk.bf16.mxu1 %vm953_vm3, %v952_v3 }
 0x1b3   : > { %v820_v46 = vpop.f32.mrf.mxu1 }
 0x1b4   : > { %v527_v47 = vadd.f32 %v820_v46, %v460_v44 }
 0x1b5   : > { %v518_v49 = vpop.f32.mrf.mxu1 }
 0x1b6   : > { %v519_v50 = vadd.f32 %v518_v49, %v450_v48  ;;  %v535_v52 = vmul.f32 0.2, %v527_v47 }
 0x1b7   : > { %v821_v51 = vpop.f32.mrf.mxu1 }
 0x1b8   : > { %v530_v53 = vadd.f32 %v821_v51, %v465_v45  ;;  %v533_v56 = vmul.f32 0.2, %v519_v50  ;;  %v539_v59 = vmax.f32 %v527_v47, %v535_v52 }
 0x1b9   : > { %v521_v55 = vpop.f32.mrf.mxu1 }
 0x1ba   : > { %v536_v57 = vmul.f32 0.2, %v530_v53  ;;  %v522_v58 = vadd.f32 %v521_v55, %v455_v54  ;;  %v537_v62 = vmax.f32 %v519_v50, %v533_v56 }
 0x1bc   : > { %v540_v60 = vmax.f32 %v530_v53, %v536_v57  ;;  %v534_v61 = vmul.f32 0.2, %v522_v58 }
 0x1be   : > { %v538_v63 = vmax.f32 %v522_v58, %v534_v61  ;;  %v546_v0 = vpack.c.bf16 %v540_v60, %v539_v59 }
 0x1c0   : > { %822 = vmatprep.subr.bf16.mxu0 %v546_v0  ;;  %v545_v1 = vpack.c.bf16 %v538_v63, %v537_v62 }
 0x1c1   : > { %823 = vmatpush3.bf16.msra.mxu0 %v546_v0 }
 0x1c2   : > { %824 = vmatprep.subr.bf16.mxu0 %v545_v1 }
 0x1c5   : > { %825 = vmatpush3.bf16.msra.mxu0 %v545_v1 }
 0x1c8   : > { %827 = vmatmul.mubr.msk.bf16.vlgmr.msra.gmra.mxu0 %vm477_vm2, %v888_v2 }
 0x288   : > { %v828_v7 = vpop.f32.mrf.mxu0 }
 0x289   : > { %v630_v8 = vadd.f32 %v828_v7, %v564_v4 }
 0x28a   : > { %v621_v9 = vpop.f32.mrf.mxu0 }
 0x28b   : > { %v638_v12 = vmul.f32 0.2, %v630_v8  ;;  %v622_v13 = vadd.f32 %v621_v9, %v554_v10 }
 0x28c   : > { %v829_v11 = vpop.f32.mrf.mxu0 }
 0x28d   : > { %v633_v14 = vadd.f32 %v829_v11, %v569_v6  ;;  %v642_v19 = vmax.f32 %v630_v8, %v638_v12  ;;  %v636_v20 = vmul.f32 0.2, %v622_v13 }
 0x28e   : > { %v624_v16 = vpop.f32.mrf.mxu0 }
 0x28f   : > { %v639_v17 = vmul.f32 0.2, %v633_v14  ;;  %v625_v18 = vadd.f32 %v624_v16, %v559_v15  ;;  %v640_v25 = vmax.f32 %v622_v13, %v636_v20 }
 0x291   : > { %v643_v21 = vmax.f32 %v633_v14, %v639_v17  ;;  %v637_v22 = vmul.f32 0.2, %v625_v18 }
 0x293   : > { %v646_v23 = vpack.c.bf16 %v643_v21, %v642_v19  ;;  %v641_v24 = vmax.f32 %v625_v18, %v637_v22 }
 0x295   : > { %831 = vmatpush3.bf16.msra.mxu1 %v646_v23  ;;  %v645_v26 = vpack.c.bf16 %v641_v24, %v640_v25 }
 0x296   : > { %832 = vmatprep.subr.bf16.mxu1 %v952_v3 }
 0x299   : > { %833 = vmatpush3.bf16.msra.mxu1 %v645_v26 }
 0x29c   : > { %835 = vmatmul.mubr.msk.bf16.vlgmr.msra.gmra.mxu1 %vm477_vm2, %v644_v27 }
 0x35c   : > { %v690_v29 = vpop.f32.mrf.mxu1 }
 0x35d   : > { %v691_v30 = vadd.f32 %v690_v29, %v651_v28 }
 0x35e   : > { %v836_v31 = vpop.f32.mrf.mxu1 }
 0x35f   : > { %v696_v32 = vadd.f32 %v691_v30, %v1071_v5 }
 0x360   : > { %v693_v33 = vpop.f32.mrf.mxu1 }
 0x361   : > { %697 = vst [vmem:[%s323_s21] sm:$0xf] %v696_v32 }
 0x362   : > { %v837_v34 = vpop.f32.mrf.mxu1 }
 0x363   : > { %902 = shalt.err (!%p899_p3)
}
 0x364   : > { %s903_s16 = scalar_lea.hbm %s1135_s25, 64  ;;  %s907_s21 = scalar_lea.hbm %s1185_s9, 128 }
 0x365   : > { %p904_p4 = scmp.ne.s32.totalorder %s1135_s25, %s903_s16  ;;  %p908_p9 = scmp.lt.s32.totalorder %s1135_s25, %s1185_s9 }
 0x366   : > { %p909_p10 = scmp.lt.s32.totalorder %s907_s21, %s903_s16 }
 0x367   : > { %p905_p7 = pnand %p904_p4, %p1043_p5 }
 0x368   : > { %p910_p11 = por %p909_p10, %p908_p9 }
 0x369   : > { %p906_p8 = pneg %p905_p7 }
 0x36b   : > { %p911_p12 = pnand %p910_p11, %p906_p8 }
 0x36d   : > { %914 = shalt.err (!%p911_p12)
}
 0x36e   : > { %839 = dma.vmem_to_hbm [thread:$0]  (%p1043_p5), %s1137_s22, 64, %s1135_s25, %s699_s13  }
 0x36f PF: > { %p845_p13 = scmp.ge.s32.totalorder %s949_s12, 2  ;;  %s724_s26 = sand.u32 1, %s937_s30  }
 0x370   : > { %s725_s27 = scalar_lea.sflag [#allocation3], %s724_s26 }
 0x371   : > { %p842_p0 = pnand %p845_p13, %p1047_p6 }
 0x373   : > { %p843_p1 = pneg %p842_p0 }
 0x375   : > { %932 = dma.done.wait (%p843_p1), %s725_s27, 64  }
 0x376   : > { %934 = vsyncadd (%p843_p1), %s725_s27, 4294967232  ;;  %p19_p2 = scmp.ge.s32.totalorder %s1030_s15, 4   ;;  %s1188_s30 = smov %s941_s10 }
 0x377   : > { %s1189_s10 = smov %s945_s11  ;;  %s1190_s11 = smov %s1041_s18 }
 0x378   : > { %s1191_s12 = smov %s1030_s15  ;;  %21 = sbr.rel (!%p19_p2) target bundleno = 3 (0x3), region = 91 }
 0x37d   :  { %730 = vsyncpa [#allocation3], 1 }
 0x37e   :  { %732 = vsyncpa [#allocation3 + $0x1], 1 }

</bundles_post_ra>
